<compile_context>
chip_gen: v7x
topology: tpu7x:2x2x1
jax: 0.10.0
libtpu: 0.0.40
codegen_flags: <defaults>
</compile_context>

<pallas_src>
import jax
import jax.numpy as jnp
from jax.experimental import pallas as pl
from jax.experimental.pallas import tpu as pltpu

_NEG = -1e30  # finite "minus infinity" filler for padded logit lanes (no NaNs)


def _round_up(x, m):
    return (x + m - 1) // m * m


def pack_params(params):
    """Pack all DMV parameters into one lane-padded f32 slab (done once, host-side).

    Slab layout (all segment starts 8-row aligned, lane width L = round_up(max(d,K,C),128)):
      rows [0, 4d)        W_agg = vstack([W1,W2,W3,W4]), zero-padded to L lanes
      rows [r_wh2z, +L)   W_h2z zero-padded to [L, L]   (rows d.. zero)
      row   r_bagg        b_agg zero-padded to L lanes
      row   r_bh2z        b_h2z, padded lanes set to -1e30 (keeps padded logits dead)
      rows [r_pz2c, +L)   softmax(z2c) zero-padded to [L, L]   (hoisted from the kernel)
    """
    d = params["W1"].shape[0]
    K = params["W_h2z"].shape[1]
    C = params["z2c"].shape[1]
    L = _round_up(max(d, K, C), 128)

    r_wh2z = _round_up(4 * d, 8)
    r_bagg = _round_up(r_wh2z + L, 8)
    r_bh2z = r_bagg + 8
    r_pz2c = r_bh2z + 8
    R = _round_up(r_pz2c + L, 8)

    W_agg = jnp.concatenate(
        [params["W1"], params["W2"], params["W3"], params["W4"]], axis=0)  # [4d, d]
    p_z2c = jax.nn.softmax(params["z2c"].astype(jnp.float32), axis=-1)     # [K, C]

    slab = jnp.zeros((R, L), jnp.float32)
    slab = slab.at[0:4 * d, 0:d].set(W_agg.astype(jnp.float32))
    slab = slab.at[r_wh2z:r_wh2z + d, 0:K].set(params["W_h2z"].astype(jnp.float32))
    slab = slab.at[r_bagg, 0:d].set(params["b_agg"].astype(jnp.float32)[0])
    slab = slab.at[r_bh2z, :].set(_NEG)
    slab = slab.at[r_bh2z, 0:K].set(params["b_h2z"].astype(jnp.float32)[0])
    slab = slab.at[r_pz2c:r_pz2c + K, 0:C].set(p_z2c)

    meta = dict(d=d, K=K, C=C, L=L, R=R,
                r_wh2z=r_wh2z, r_bagg=r_bagg, r_bh2z=r_bh2z, r_pz2c=r_pz2c)
    return {"slab": slab, "meta": meta}


def _make_kernel(d, L, r_wh2z, r_bagg, r_bh2z, r_pz2c):
    def kernel(u_ref, v_ref, slab_ref, logpz_ref, logpc_ref):
        u = u_ref[...].astype(jnp.float32)                             # [bb, d]
        v = v_ref[...].astype(jnp.float32)                             # [bb, d]
        # feat = cat([u, v, u-v, u*v], -1): one 128-lane vreg row-set at d=32.
        feat = jnp.concatenate([u, v, u - v, u * v], axis=-1)          # [bb, 4d]

        # agg Linear as ONE fused MXU matmul (contraction depth 4d).
        w_agg = slab_ref[0:4 * d, :]                                   # [4d, L]
        h = jnp.dot(feat, w_agg, preferred_element_type=jnp.float32)
        h = h + slab_ref[r_bagg:r_bagg + 1, :]                         # [bb, L]; lanes d.. stay 0

        # h2z Linear; padded logit lanes come out as -1e30 via the b_h2z padding.
        w_h2z = slab_ref[r_wh2z:r_wh2z + L, :]                         # [L, L]
        z = jnp.dot(h, w_h2z, preferred_element_type=jnp.float32)
        z = z + slab_ref[r_bh2z:r_bh2z + 1, :]                         # [bb, L]

        # log_softmax over lanes (padded lanes contribute exp(-1e30) == 0).
        m = jnp.max(z, axis=-1, keepdims=True)
        lse = m + jnp.log(jnp.sum(jnp.exp(z - m), axis=-1, keepdims=True))
        logp_z = z - lse                                               # [bb, L]
        logpz_ref[...] = logp_z                                        # lane-dense store

        # logp_c = logsumexp_k(logp_z[:,k,None] + log_softmax(z2c)[k,:]) rewritten as
        #   m2 + log(exp(logp_z - m2) @ softmax(z2c))   -> one small MXU matmul,
        # no [B,K,C] materialization, no sublane broadcast/reduction.
        m2 = jnp.max(logp_z, axis=-1, keepdims=True)                   # [bb, 1]
        p_z2c = slab_ref[r_pz2c:r_pz2c + L, :]                         # [L, L]
        s = jnp.dot(jnp.exp(logp_z - m2), p_z2c,
                    preferred_element_type=jnp.float32)                # [bb, L]
        logpc_ref[...] = m2 + jnp.log(s)   # padded lanes are -inf; sliced off in wrapper

    return kernel


def dmv_forward(u_vec, v_vec, packed):
    """DMVModel.forward equivalent: returns {'logp_z': [B,K], 'logp_c': [B,C]}."""
    slab, meta = packed["slab"], packed["meta"]
    d, K, C, L, R = meta["d"], meta["K"], meta["C"], meta["L"], meta["R"]
    B = u_vec.shape[0]

    # One batch tile for small B; tile (and shard across TensorCores) for large B.
    block_b = B if B <= 256 else 256
    assert B % block_b == 0, "for large B, pad the batch to a multiple of 256"

    kernel = _make_kernel(d, L, meta["r_wh2z"], meta["r_bagg"],
                          meta["r_bh2z"], meta["r_pz2c"])

    logp_z_pad, logp_c_pad = pl.pallas_call(
        kernel,
        out_shape=(jax.ShapeDtypeStruct((B, L), jnp.float32),
                   jax.ShapeDtypeStruct((B, L), jnp.float32)),
        grid=(B // block_b,),
        in_specs=[
            pl.BlockSpec((block_b, d), lambda i: (i, 0)),
            pl.BlockSpec((block_b, d), lambda i: (i, 0)),
            pl.BlockSpec((R, L), lambda i: (0, 0)),   # constant block -> weights stay resident
        ],
        out_specs=(
            pl.BlockSpec((block_b, L), lambda i: (i, 0)),
            pl.BlockSpec((block_b, L), lambda i: (i, 0)),
        ),
        compiler_params=pltpu.CompilerParams(
            dimension_semantics=("parallel",)),        # batch tiles shard across cores (v7x)
    )(u_vec, v_vec, slab)

    return {"logp_z": logp_z_pad[:, :K], "logp_c": logp_c_pad[:, :C]}


def dmv_forward_ref(u, v, p):
    """Pure-JAX reference mirroring the PyTorch forward (full-f32 matmuls)."""
    hi = jax.lax.Precision.HIGHEST
    W_agg = jnp.concatenate([p["W1"], p["W2"], p["W3"], p["W4"]], axis=0)  # [4d, d]
    feat = jnp.concatenate([u, v, u - v, u * v], axis=-1)
    h = jnp.dot(feat, W_agg, precision=hi) + p["b_agg"]
    logp_z = jax.nn.log_softmax(jnp.dot(h, p["W_h2z"], precision=hi) + p["b_h2z"], axis=-1)
    logp_z2c = jax.nn.log_softmax(p["z2c"], axis=-1)
    logp_z_c = logp_z[:, :, None] + logp_z2c[None, :, :]
    logp_c = jax.scipy.special.logsumexp(logp_z_c, axis=1)
    return {"logp_z": logp_z, "logp_c": logp_c}


def init_params(key, d, K, C):
    ks = jax.random.split(key, 8)
    s_agg = 1.0 / jnp.sqrt(4.0 * d)   # PyTorch Linear default init U(-1/sqrt(fan_in), +)
    s_h2z = 1.0 / jnp.sqrt(float(d))
    return {
        # agg Linear weight stored as (in, out); split into 4 (d, d) blocks.
        # NOTE: real PyTorch checkpoints store Linear weights (out, in) -> transpose first.
        "W1": jax.random.uniform(ks[0], (d, d), jnp.float32, -s_agg, s_agg),
        "W2": jax.random.uniform(ks[1], (d, d), jnp.float32, -s_agg, s_agg),
        "W3": jax.random.uniform(ks[2], (d, d), jnp.float32, -s_agg, s_agg),
        "W4": jax.random.uniform(ks[3], (d, d), jnp.float32, -s_agg, s_agg),
        "b_agg": jax.random.uniform(ks[4], (1, d), jnp.float32, -s_agg, s_agg),
        "W_h2z": jax.random.uniform(ks[5], (d, K), jnp.float32, -s_h2z, s_h2z),
        "b_h2z": jax.random.uniform(ks[6], (1, K), jnp.float32, -s_h2z, s_h2z),
        # z2c.data.uniform_(-1/K, 1/K)
        "z2c": jax.random.uniform(ks[7], (K, C), jnp.float32, -1.0 / K, 1.0 / K),
    }


if __name__ == "__main__":
    # Small shapes consistent with the module: batch=8, hidden d=32, K=11, C=30.
    B, d, K, C = 8, 32, 11, 30
    key = jax.random.PRNGKey(0)
    k_u, k_v, k_p = jax.random.split(key, 3)

    u_vec = jax.random.normal(k_u, (B, d), jnp.float32)   # BERT pooled output of u_dict
    v_vec = jax.random.normal(k_v, (B, d), jnp.float32)   # BERT pooled output of v_dict
    params = init_params(k_p, d, K, C)
    packed = pack_params(params)                          # one-time host-side packing

    out = dmv_forward(u_vec, v_vec, packed)
    jax.block_until_ready(out)

    ref = dmv_forward_ref(u_vec, v_vec, params)
    assert out["logp_z"].shape == (B, K) and out["logp_c"].shape == (B, C)
    assert jnp.allclose(out["logp_z"], ref["logp_z"], atol=2e-3, rtol=2e-3)
    assert jnp.allclose(out["logp_c"], ref["logp_c"], atol=2e-3, rtol=2e-3)

    print("KERNEL_OK")
</pallas_src>

<mosaic_0001>
module attributes {stable_mosaic.version = 11 : i64} {
  func.func @kernel(%arg0: i32, %arg1: memref<8x32xf32, #tpu.memory_space<vmem>>, %arg2: memref<8x32xf32, #tpu.memory_space<vmem>>, %arg3: memref<400x128xf32, #tpu.memory_space<vmem>>, %arg4: memref<8x128xf32, #tpu.memory_space<vmem>>, %arg5: memref<8x128xf32, #tpu.memory_space<vmem>>) attributes {dimension_semantics = [#tpu.dimension_semantics<parallel>], iteration_bounds = array<i64: 1>, scalar_prefetch = 0 : i64, scratch_operands = 0 : i64, tpu.core_type = #tpu.core_type<tc>, window_params = [{transform_indices = @transform_0, window_bounds = array<i64: 8, 32>}, {transform_indices = @transform_1, window_bounds = array<i64: 8, 32>}, {pipeline_mode = #tpu.pipeline_mode<synchronous>, transform_indices = @transform_2, window_bounds = array<i64: 400, 128>}, {transform_indices = @transform_3, window_bounds = array<i64: 8, 128>}, {transform_indices = @transform_4, window_bounds = array<i64: 8, 128>}]} {
    %c0 = arith.constant 0 : index
    %c0_0 = arith.constant 0 : index
    %0 = vector.load %arg1[%c0, %c0_0] : memref<8x32xf32, #tpu.memory_space<vmem>>, vector<8x32xf32>
    %c0_1 = arith.constant 0 : index
    %c0_2 = arith.constant 0 : index
    %1 = vector.load %arg2[%c0_1, %c0_2] : memref<8x32xf32, #tpu.memory_space<vmem>>, vector<8x32xf32>
    %2 = arith.subf %0, %1 : vector<8x32xf32>
    %3 = arith.mulf %0, %1 : vector<8x32xf32>
    %4 = tpu.concatenate %0, %1, %2, %3 in 1 : vector<8x32xf32>, vector<8x32xf32>, vector<8x32xf32>, vector<8x32xf32> -> vector<8x128xf32>
    %c0_3 = arith.constant 0 : index
    %c0_4 = arith.constant 0 : index
    %5 = vector.load %arg3[%c0_3, %c0_4] : memref<400x128xf32, #tpu.memory_space<vmem>>, vector<128x128xf32>
    %cst = arith.constant dense<0.000000e+00> : vector<8x128xf32>
    %6 = tpu.matmul %4, %5, %cst {dimension_numbers = #tpu.dot_dimension_numbers<[1], [0], [0], [1], [0, 0, 1, 1], [], []>} : vector<8x128xf32>, vector<128x128xf32>, vector<8x128xf32> -> vector<8x128xf32>
    %c256 = arith.constant 256 : index
    %c0_5 = arith.constant 0 : index
    %7 = vector.load %arg3[%c256, %c0_5] : memref<400x128xf32, #tpu.memory_space<vmem>>, vector<1x128xf32>
    %8 = vector.broadcast %7 : vector<1x128xf32> to vector<8x128xf32>
    %9 = arith.addf %6, %8 : vector<8x128xf32>
    %c128 = arith.constant 128 : index
    %c0_6 = arith.constant 0 : index
    %10 = vector.load %arg3[%c128, %c0_6] : memref<400x128xf32, #tpu.memory_space<vmem>>, vector<128x128xf32>
    %cst_7 = arith.constant dense<0.000000e+00> : vector<8x128xf32>
    %11 = tpu.matmul %9, %10, %cst_7 {dimension_numbers = #tpu.dot_dimension_numbers<[1], [0], [0], [1], [0, 0, 1, 1], [], []>} : vector<8x128xf32>, vector<128x128xf32>, vector<8x128xf32> -> vector<8x128xf32>
    %c264 = arith.constant 264 : index
    %c0_8 = arith.constant 0 : index
    %12 = vector.load %arg3[%c264, %c0_8] : memref<400x128xf32, #tpu.memory_space<vmem>>, vector<1x128xf32>
    %13 = vector.broadcast %12 : vector<1x128xf32> to vector<8x128xf32>
    %14 = arith.addf %11, %13 : vector<8x128xf32>
    %cst_9 = arith.constant dense<0xFF800000> : vector<8xf32>
    %15 = vector.multi_reduction <maximumf>, %14, %cst_9 [1] : vector<8x128xf32> to vector<8xf32>
    %16 = vector.shape_cast %15 : vector<8xf32> to vector<8x1xf32>
    %17 = vector.broadcast %16 : vector<8x1xf32> to vector<8x128xf32>
    %18 = arith.subf %14, %17 : vector<8x128xf32>
    %19 = math.exp %18 : vector<8x128xf32>
    %cst_10 = arith.constant dense<0.000000e+00> : vector<8xf32>
    %20 = vector.multi_reduction <add>, %19, %cst_10 [1] : vector<8x128xf32> to vector<8xf32>
    %21 = vector.shape_cast %20 : vector<8xf32> to vector<8x1xf32>
    %22 = math.log %21 : vector<8x1xf32>
    %23 = arith.addf %16, %22 : vector<8x1xf32>
    %24 = vector.broadcast %23 : vector<8x1xf32> to vector<8x128xf32>
    %25 = arith.subf %14, %24 : vector<8x128xf32>
    %c0_11 = arith.constant 0 : index
    %c0_12 = arith.constant 0 : index
    %26 = vector.load %arg4[%c0_11, %c0_12] : memref<8x128xf32, #tpu.memory_space<vmem>>, vector<8x128xf32>
    tpu.vector_store %arg4[%c0_11, %c0_12], %25 {strides = array<i32>} : memref<8x128xf32, #tpu.memory_space<vmem>>, vector<8x128xf32>,
    %cst_13 = arith.constant dense<0xFF800000> : vector<8xf32>
    %27 = vector.multi_reduction <maximumf>, %25, %cst_13 [1] : vector<8x128xf32> to vector<8xf32>
    %28 = vector.shape_cast %27 : vector<8xf32> to vector<8x1xf32>
    %c272 = arith.constant 272 : index
    %c0_14 = arith.constant 0 : index
    %29 = vector.load %arg3[%c272, %c0_14] : memref<400x128xf32, #tpu.memory_space<vmem>>, vector<128x128xf32>
    %30 = vector.broadcast %28 : vector<8x1xf32> to vector<8x128xf32>
    %31 = arith.subf %25, %30 : vector<8x128xf32>
    %32 = math.exp %31 : vector<8x128xf32>
    %cst_15 = arith.constant dense<0.000000e+00> : vector<8x128xf32>
    %33 = tpu.matmul %32, %29, %cst_15 {dimension_numbers = #tpu.dot_dimension_numbers<[1], [0], [0], [1], [0, 0, 1, 1], [], []>} : vector<8x128xf32>, vector<128x128xf32>, vector<8x128xf32> -> vector<8x128xf32>
    %34 = math.log %33 : vector<8x128xf32>
    %35 = vector.broadcast %28 : vector<8x1xf32> to vector<8x128xf32>
    %36 = arith.addf %35, %34 : vector<8x128xf32>
    %c0_16 = arith.constant 0 : index
    %c0_17 = arith.constant 0 : index
    %37 = vector.load %arg5[%c0_16, %c0_17] : memref<8x128xf32, #tpu.memory_space<vmem>>, vector<8x128xf32>
    tpu.vector_store %arg5[%c0_16, %c0_17], %36 {strides = array<i32>} : memref<8x128xf32, #tpu.memory_space<vmem>>, vector<8x128xf32>,
    return
  }
  func.func @transform_0(%arg0: i32) -> (i32, i32) {
    %c0_i32 = arith.constant 0 : i32
    %c0_i32_0 = arith.constant 0 : i32
    return %arg0, %c0_i32 : i32, i32
  }
  func.func @transform_1(%arg0: i32) -> (i32, i32) {
    %c0_i32 = arith.constant 0 : i32
    %c0_i32_0 = arith.constant 0 : i32
    return %arg0, %c0_i32 : i32, i32
  }
  func.func @transform_2(%arg0: i32) -> (i32, i32) {
    %c0_i32 = arith.constant 0 : i32
    %c0_i32_0 = arith.constant 0 : i32
    %c0_i32_1 = arith.constant 0 : i32
    return %c0_i32, %c0_i32_0 : i32, i32
  }
  func.func @transform_3(%arg0: i32) -> (i32, i32) {
    %c0_i32 = arith.constant 0 : i32
    %c0_i32_0 = arith.constant 0 : i32
    return %arg0, %c0_i32 : i32, i32
  }
  func.func @transform_4(%arg0: i32) -> (i32, i32) {
    %c0_i32 = arith.constant 0 : i32
    %c0_i32_0 = arith.constant 0 : i32
    return %arg0, %c0_i32 : i32, i32
  }
}

</mosaic_0001>

<bundles_post_ra>
// kernel: tpu_custom_call.1
= control target key start
LH: loop header
LB: loop body
LE: loop exit
PB: predicated region body
PF: predicated region fallthrough
CT: control target
= control target key end

     0   :  { %10 = vsyncpa [#allocation3], 0  ;;  %s898_s0 = inlined_call_operand.hbm [shape: f32[8,32], index: 0, kind: input, shape index: {}]   ;;  %s899_s1 = inlined_call_operand.hbm [shape: f32[8,32], index: 1, kind: input, shape index: {}]   ;;  %s900_s2 = inlined_call_operand.hbm [shape: f32[400,128], index: 2, kind: input, shape index: {}]   ;;  %s901_s3 = inlined_call_operand.hbm [shape: f32[8,128], index: 3, kind: output, shape index: {0}]   ;;  %s902_s4 = inlined_call_operand.hbm [shape: f32[8,128], index: 4, kind: output, shape index: {1}]  }
   0x1   :  { %11 = vsyncpa [#allocation6], 0 }
   0x2   :  { %12 = vsyncpa [#allocation4], 0 }
   0x3   :  { %13 = vsyncpa [#allocation10], 0  ;;  %s765_s15 = smov [#allocation5]   ;;  %s766_s17 = smov [#allocation2]  }
   0x4   :  { %s30_s16 = sshll.u32 %s765_s15, 4  ;;  %s20_s18 = sshll.u32 %s766_s17, 4  ;;  %s31_s16 = int_to_ptr.vmem [resolvable:$true] %s30_s16  ;;  %s21_s18 = int_to_ptr.vmem [resolvable:$true] %s20_s18 }
   0x5   :  { %s647_s21 = scalar_lea.hbm %s899_s1, 128 }
   0x6   :  { %p648_p0 = scmp.ne.s32.totalorder %s899_s1, %s647_s21  ;;  %p651_p1 = scmp.lt.u32.totalorder %s647_s21, %s899_s1 }
   0x8   :  { %p653_p2 = pnand %p651_p1, %p648_p0 }
   0xa   :  { %656 = shalt.err (!%p653_p2)
}
   0xb   :  { %s657_s26 = scalar_lea.vmem %s31_s16, 128  ;;  %p662_p4 = scmp.lt.s32.totalorder %s31_s16, %s31_s16 }
   0xc   :  { %p658_p3 = scmp.ne.s32.totalorder %s31_s16, %s657_s26  ;;  %p663_p5 = scmp.lt.s32.totalorder %s657_s26, %s657_s26 }
   0xe   :  { %p664_p6 = por %p663_p5, %p662_p4 }
  0x10   :  { %p665_p7 = pnand %p664_p6, %p658_p3 }
  0x12   :  { %668 = shalt.err (!%p665_p7)
}
  0x13   :  { %33 = dma.hbm_to_vmem [thread:$0]  %s899_s1, 128, %s31_s16, [#allocation6]  }
  0x14   :  { %s669_s5 = scalar_lea.hbm %s898_s0, 128 }
  0x15   :  { %p670_p8 = scmp.ne.s32.totalorder %s898_s0, %s669_s5  ;;  %p673_p9 = scmp.lt.u32.totalorder %s669_s5, %s898_s0 }
  0x17   :  { %p675_p10 = pnand %p673_p9, %p670_p8 }
  0x19   :  { %678 = shalt.err (!%p675_p10)
}
  0x1a   :  { %s679_s10 = scalar_lea.vmem %s21_s18, 128  ;;  %p684_p12 = scmp.lt.s32.totalorder %s21_s18, %s21_s18 }
  0x1b   :  { %p680_p11 = scmp.ne.s32.totalorder %s21_s18, %s679_s10  ;;  %p685_p13 = scmp.lt.s32.totalorder %s679_s10, %s679_s10 }
  0x1d   :  { %p686_p0 = por %p685_p13, %p684_p12 }
  0x1f   :  { %p687_p1 = pnand %p686_p0, %p680_p11 }
  0x21   :  { %690 = shalt.err (!%p687_p1)
}
  0x22   :  { %23 = dma.hbm_to_vmem [thread:$0]  %s898_s0, 128, %s21_s18, [#allocation3]  }
  0x23   :  { %s767_s12 = smov [#allocation7]   ;;  %s691_s16 = scalar_lea.hbm %s900_s2, 6400 }
  0x24   :  { %s39_s13 = sshll.u32 %s767_s12, 4  ;;  %p692_p2 = scmp.ne.s32.totalorder %s900_s2, %s691_s16  ;;  %s40_s13 = int_to_ptr.vmem [resolvable:$true] %s39_s13 }
  0x25   :  { %p695_p3 = scmp.lt.u32.totalorder %s691_s16, %s900_s2 }
  0x27   :  { %p697_p4 = pnand %p695_p3, %p692_p2 }
  0x29   :  { %700 = shalt.err (!%p697_p4)
}
  0x2a   :  { %s701_s22 = scalar_lea.vmem %s40_s13, 6400  ;;  %p706_p6 = scmp.lt.s32.totalorder %s40_s13, %s40_s13 }
  0x2b   :  { %p702_p5 = scmp.ne.s32.totalorder %s40_s13, %s701_s22  ;;  %p707_p7 = scmp.lt.s32.totalorder %s701_s22, %s701_s22 }
  0x2d   :  { %p708_p8 = por %p707_p7, %p706_p6 }
  0x2f   :  { %p709_p9 = pnand %p708_p8, %p702_p5 }
  0x31   :  { %712 = shalt.err (!%p709_p9)
}
  0x32   :  { %s768_s0 = smov 128   ;;  %s769_s18 = smov 8  }
  0x33   :  { %45 = dma.hbm_to_vmem [thread:$0]  %s900_s2, 6400, %s40_s13, [#allocation6], %s768_s0, %s768_s0, %s769_s18  }
  0x34   :  { %757 = dma.done.wait [#allocation3], 128  }
  0x35   :  { %758 = vsyncadd [#allocation3], 4294967168 }
  0x36   :  { %759 = dma.done.wait [#allocation6], 6528  }
  0x37   :  { %760 = vsyncadd [#allocation6], 4294960768  ;;  %v770_v0 = vmov 0.0|0.0   ;;  %vm771_vm0 = vmmov 0   ;;  %v772_v1 = vmov 0.0   ;;  %v56_v2 = vld [vmem:[#allocation5] sm:$0xff] }
  0x38   :  { %554 = vmatprep.subr.bf16.mxu0 %v770_v0  ;;  %578 = vmatprep.subr.bf16.mxu1 %v770_v0  ;;  %v845_v3 = vld [vmem:[#allocation2] sm:$0xff]  ;;  %v77_v4 = vld [vmem:[#allocation7] sm:$0xff]  ;;  %s773_s2 = smov 32   ;;  %v78_v7 = vld [vmem:[#allocation7 + $0x8] sm:$0xff]  ;;  %s774_s25 = smov 96   ;;  %vm71_vm1 = vcmask 261120  }
  0x39   :  { %481 = vmatprep.mubr.msk.f32.mxu0 %vm771_vm0, %v772_v1  ;;  %516 = vmatprep.mubr.msk.f32.mxu1 %vm771_vm0, %v772_v1  ;;  %v57_v5 = vsub.f32 %v845_v3, %v56_v2  ;;  %v58_v6 = vmul.f32 %v56_v2, %v845_v3  ;;  %v79_v8 = vld [vmem:[#allocation7 + $0x10] sm:$0xff]  ;;  %v80_v9 = vld [vmem:[#allocation7 + $0x18] sm:$0xff]  ;;  %v555_v10 = vpack.c.bf16 %v78_v7, %v77_v4  ;;  %s775_s26 = smov 64   ;;  %v81_v12 = vld [vmem:[#allocation7 + $0x20] sm:$0xff]  ;;  %vm73_vm2 = vcmask 523264   ;;  %s776_s27 = smov [#allocation8]  }
  0x3a   :  { %60 = vrot.lane.b32.xlu0 %v56_v2, %s773_s2  ;;  %v558_v11 = vpack.c.bf16 %v80_v9, %v79_v8  ;;  %v82_v13 = vld [vmem:[#allocation7 + $0x28] sm:$0xff]  ;;  %v168_v14 = vld [vmem:[#allocation7 + $0x80] sm:$0xff]  ;;  %v170_v16 = vld [vmem:[#allocation7 + $0x90] sm:$0xff]  ;;  %vm75_vm3 = vcmask 785408   ;;  %s372_s28 = sshll.u32 %s776_s27, 4  ;;  %s373_s28 = int_to_ptr.vmem [resolvable:$true] %s372_s28 }
  0x3b   :  { %68 = vrot.lane.b32.xlu1 %v58_v6, %s774_s25  ;;  %556 = vmatpush3.bf16.msra.mxu0 %v555_v10  ;;  %v169_v15 = vld [vmem:[#allocation7 + $0x88] sm:$0xff]  ;;  %v171_v18 = vld [vmem:[#allocation7 + $0x98] sm:$0xff]  ;;  %v561_v19 = vpack.c.bf16 %v82_v13, %v81_v12  ;;  %v83_v20 = vld [vmem:[#allocation7 + $0x30] sm:$0xff]  ;;  %s713_s29 = scalar_lea.vmem %s373_s28, 128  ;;  %p718_p11 = scmp.lt.s32.totalorder %s373_s28, %s373_s28 }
  0x3c   :  { %557 = vmatprep.subr.bf16.mxu0 %v770_v0  ;;  %v579_v17 = vpack.c.bf16 %v169_v15, %v168_v14  ;;  %v84_v21 = vld [vmem:[#allocation7 + $0x38] sm:$0xff]  ;;  %v582_v22 = vpack.c.bf16 %v171_v18, %v170_v16  ;;  %v172_v23 = vld [vmem:[#allocation7 + $0xa0] sm:$0xff]  ;;  %v173_v24 = vld [vmem:[#allocation7 + $0xa8] sm:$0xff]  ;;  %p714_p10 = scmp.ne.s32.totalorder %s373_s28, %s713_s29  ;;  %p719_p12 = scmp.lt.s32.totalorder %s713_s29, %s713_s29 }
  0x3d   :  { %v564_v25 = vpack.c.bf16 %v84_v21, %v83_v20  ;;  %v85_v26 = vld [vmem:[#allocation7 + $0x40] sm:$0xff]  ;;  %v86_v27 = vld [vmem:[#allocation7 + $0x48] sm:$0xff]  ;;  %v585_v28 = vpack.c.bf16 %v173_v24, %v172_v23  ;;  %v174_v29 = vld [vmem:[#allocation7 + $0xb0] sm:$0xff] }
  0x3e   :  { %64 = vrot.lane.b32.xlu0 %v57_v5, %s775_s26  ;;  %580 = vmatpush3.bf16.msra.mxu1 %v579_v17  ;;  %v175_v30 = vld [vmem:[#allocation7 + $0xb8] sm:$0xff]  ;;  %v567_v31 = vpack.c.bf16 %v86_v27, %v85_v26  ;;  %v87_v32 = vld [vmem:[#allocation7 + $0x50] sm:$0xff]  ;;  %v176_v35 = vld [vmem:[#allocation7 + $0xc0] sm:$0xff]  ;;  %p720_p13 = por %p719_p12, %p718_p11 }
  0x3f   :  { %559 = vmatpush3.bf16.msra.mxu0 %v558_v11  ;;  %581 = vmatprep.subr.bf16.mxu1 %v770_v0  ;;  %v88_v33 = vld [vmem:[#allocation7 + $0x58] sm:$0xff]  ;;  %v588_v34 = vpack.c.bf16 %v175_v30, %v174_v29  ;;  %v177_v36 = vld [vmem:[#allocation7 + $0xc8] sm:$0xff]  ;;  %v89_v38 = vld [vmem:[#allocation7 + $0x60] sm:$0xff] }
  0x40   :  { %560 = vmatprep.subr.bf16.mxu0 %v770_v0  ;;  %v570_v37 = vpack.c.bf16 %v88_v33, %v87_v32  ;;  %v90_v39 = vld [vmem:[#allocation7 + $0x68] sm:$0xff]  ;;  %v591_v40 = vpack.c.bf16 %v177_v36, %v176_v35  ;;  %v178_v41 = vld [vmem:[#allocation7 + $0xd0] sm:$0xff]  ;;  %v179_v42 = vld [vmem:[#allocation7 + $0xd8] sm:$0xff]  ;;  %p721_p0 = pnand %p720_p13, %p714_p10 }
  0x41   :  { %v573_v43 = vpack.c.bf16 %v90_v39, %v89_v38  ;;  %v91_v44 = vld [vmem:[#allocation7 + $0x70] sm:$0xff]  ;;  %v92_v45 = vld [vmem:[#allocation7 + $0x78] sm:$0xff]  ;;  %v594_v46 = vpack.c.bf16 %v179_v42, %v178_v41  ;;  %v180_v47 = vld [vmem:[#allocation7 + $0xe0] sm:$0xff] }
  0x42   :  { %583 = vmatpush3.bf16.msra.mxu1 %v582_v22  ;;  %v181_v48 = vld [vmem:[#allocation7 + $0xe8] sm:$0xff]  ;;  %v576_v49 = vpack.c.bf16 %v92_v45, %v91_v44  ;;  %v182_v57 = vld [vmem:[#allocation7 + $0xf0] sm:$0xff]  ;;  %v183_v58 = vld [vmem:[#allocation7 + $0xf8] sm:$0xff] }
  0x43   :  { %562 = vmatpush3.bf16.msra.mxu0 %v561_v19  ;;  %584 = vmatprep.subr.bf16.mxu1 %v770_v0  ;;  %v597_v50 = vpack.c.bf16 %v181_v48, %v180_v47  ;;  %v600_v59 = vpack.c.bf16 %v183_v58, %v182_v57  ;;  %v396_v60 = vld [vmem:[#allocation7 + $0x100] ss:$0 sm:$0xff]  ;;  %v397_v2 = vld [vmem:[#allocation7 + $0x108] ss:$0 sm:$0xff]  ;;  %v274_v10 = vld [vmem:[#allocation7 + $0x118] sm:$0xff] }
  0x44   :  { %563 = vmatprep.subr.bf16.mxu0 %v770_v0  ;;  %v275_v11 = vld [vmem:[#allocation7 + $0x120] sm:$0xff]  ;;  %v276_v13 = vld [vmem:[#allocation7 + $0x128] sm:$0xff]  ;;  %v277_v15 = vld [vmem:[#allocation7 + $0x130] sm:$0xff] }
  0x45   :  { %v606_v14 = vpack.c.bf16 %v276_v13, %v275_v11  ;;  %v278_v16 = vld [vmem:[#allocation7 + $0x138] sm:$0xff]  ;;  %v279_v18 = vld [vmem:[#allocation7 + $0x140] sm:$0xff]  ;;  %v280_v19 = vld [vmem:[#allocation7 + $0x148] sm:$0xff] }
  0x46   :  { %586 = vmatpush3.bf16.msra.mxu1 %v585_v28  ;;  %v609_v17 = vpack.c.bf16 %v278_v16, %v277_v15  ;;  %v612_v20 = vpack.c.bf16 %v280_v19, %v279_v18  ;;  %v281_v26 = vld [vmem:[#allocation7 + $0x150] sm:$0xff]  ;;  %v282_v27 = vld [vmem:[#allocation7 + $0x158] sm:$0xff]  ;;  %v283_v29 = vld [vmem:[#allocation7 + $0x160] sm:$0xff] }
  0x47   :  { %565 = vmatpush3.bf16.msra.mxu0 %v564_v25  ;;  %587 = vmatprep.subr.bf16.mxu1 %v770_v0  ;;  %v615_v28 = vpack.c.bf16 %v282_v27, %v281_v26  ;;  %v284_v30 = vld [vmem:[#allocation7 + $0x168] sm:$0xff]  ;;  %v285_v32 = vld [vmem:[#allocation7 + $0x170] sm:$0xff]  ;;  %v286_v33 = vld [vmem:[#allocation7 + $0x178] sm:$0xff] }
  0x48   :  { %566 = vmatprep.subr.bf16.mxu0 %v770_v0  ;;  %v287_v35 = vld [vmem:[#allocation7 + $0x180] sm:$0xff]  ;;  %v288_v36 = vld [vmem:[#allocation7 + $0x188] sm:$0xff] }
  0x4a   :  { %589 = vmatpush3.bf16.msra.mxu1 %v588_v34  ;;  %v621_v34 = vpack.c.bf16 %v286_v33, %v285_v32 }
  0x4b   :  { %568 = vmatpush3.bf16.msra.mxu0 %v567_v31  ;;  %590 = vmatprep.subr.bf16.mxu1 %v770_v0  ;;  %v618_v31 = vpack.c.bf16 %v284_v30, %v283_v29 }
  0x4c   :  { %569 = vmatprep.subr.bf16.mxu0 %v770_v0 }
  0x4e   :  { %592 = vmatpush3.bf16.msra.mxu1 %v591_v40 }
  0x4f   :  { %571 = vmatpush3.bf16.msra.mxu0 %v570_v37  ;;  %593 = vmatprep.subr.bf16.mxu1 %v770_v0  ;;  %v624_v37 = vpack.c.bf16 %v288_v36, %v287_v35 }
  0x50   :  { %572 = vmatprep.subr.bf16.mxu0 %v770_v0 }
  0x52   :  { %595 = vmatpush3.bf16.msra.mxu1 %v594_v46 }
  0x53   :  { %574 = vmatpush3.bf16.msra.mxu0 %v573_v43  ;;  %596 = vmatprep.subr.bf16.mxu1 %v770_v0 }
  0x54   :  { %575 = vmatprep.subr.bf16.mxu0 %v770_v0 }
  0x56   :  { %598 = vmatpush3.bf16.msra.mxu1 %v597_v50 }
  0x57   :  { %577 = vmatpush3.bf16.msra.mxu0 %v576_v49  ;;  %599 = vmatprep.subr.bf16.mxu1 %v770_v0 }
  0x58   :  { %602 = vmatprep.subr.bf16.mxu0 %v770_v0 }
  0x5a   :  { %601 = vmatpush3.bf16.msra.mxu1 %v600_v59 }
  0xac   :  { %v61_v51 = vpop.permute.xlu0 %60 }
  0xad   :  { %v69_v52 = vpop.permute.xlu1 %68  ;;  %v72_v53 = vsel %vm71_vm1, %v845_v3, %v61_v51 }
  0xb0   :  { %v65_v54 = vpop.permute.xlu0 %64 }
  0xb1   :  { %v74_v55 = vsel %vm73_vm2, %v72_v53, %v65_v54 }
  0xb2   :  { %v76_v56 = vsel %vm75_vm3, %v74_v55, %v69_v52 }
  0xb3   :  { %482 = vmatmul.mubr.f32.vlgmr.msra.gmra.mrb[0].mxu0 %v76_v56 }
  0xb4   :  { %551 = vmatprep.mubr.msk.f32.mxu0 %vm771_vm0, %v772_v1  ;;  %v273_v1 = vld [vmem:[#allocation7 + $0x110] sm:$0xff] }
  0xb5   :  { %v603_v12 = vpack.c.bf16 %v274_v10, %v273_v1 }
  0xb7   :  { %604 = vmatpush3.bf16.msra.mxu0 %v603_v12 }
  0xb8   :  { %605 = vmatprep.subr.bf16.mxu0 %v770_v0 }
  0xbb   :  { %607 = vmatpush3.bf16.msra.mxu0 %v606_v14 }
  0xbc   :  { %608 = vmatprep.subr.bf16.mxu0 %v770_v0 }
  0xbf   :  { %610 = vmatpush3.bf16.msra.mxu0 %v609_v17 }
  0xc0   :  { %611 = vmatprep.subr.bf16.mxu0 %v770_v0 }
  0xc3   :  { %613 = vmatpush3.bf16.msra.mxu0 %v612_v20 }
  0xc4   :  { %614 = vmatprep.subr.bf16.mxu0 %v770_v0 }
  0xc7   :  { %616 = vmatpush3.bf16.msra.mxu0 %v615_v28 }
  0xc8   :  { %617 = vmatprep.subr.bf16.mxu0 %v770_v0 }
  0xcb   :  { %619 = vmatpush3.bf16.msra.mxu0 %v618_v31 }
  0xcc   :  { %620 = vmatprep.subr.bf16.mxu0 %v770_v0 }
  0xcf   :  { %622 = vmatpush3.bf16.msra.mxu0 %v621_v34 }
  0xd0   :  { %623 = vmatprep.subr.bf16.mxu0 %v770_v0 }
  0xd3   :  { %625 = vmatpush3.bf16.msra.mxu0 %v624_v37 }
 0x186   :  { %v164_v61 = vpop.f32.mrb[0].mxu0 }
 0x187   :  { %v165_v62 = vadd.f32 %v396_v60, %v164_v61  ;;  %v483_v63 = vpop.f32.mrb[1].mxu0 }
 0x189   :  { %517 = vmatmul.mubr.f32.vlgmr.msra.gmra.mrb[0].mxu1 %v165_v62 }
 0x25c   :  { %v255_v4 = vpop.f32.mrb[0].mxu1 }
 0x25d   :  { %v256_v5 = vadd.f32 %v397_v2, %v255_v4  ;;  %v518_v3 = vpop.f32.mrb[1].mxu1 }
 0x25f   :  { %259 = vmax.xlane.f32.xlu1 %v256_v5 }
 0x2ec   :  { %v260_v6 = vpop.xlane.xlu1 %259 }
 0x2ed   :  { %v261_v7 = vsub.f32 %v256_v5, %v260_v6 }
 0x2ef   :  { %v262_v8 = vmul.f32 1.442695, %v261_v7 }
 0x2f1   :  { %639 = vpow2.f32 %v262_v8 }
 0x2fb   :  { %v640_v9 = vpop.eup %639 }
 0x2fc   :  { %264 = vadd.xlane.f32.xlu0 %v640_v9 }
 0x389   :  { %v265_v21 = vpop.xlane.xlu0 %264 }
 0x38a   :  { %641 = vlog2.f32 %v265_v21 }
 0x394   :  { %v642_v22 = vpop.eup %641 }
 0x395   :  { %v267_v23 = vmul.f32 0.6931472, %v642_v22 }
 0x397   :  { %v268_v24 = vadd.f32 %v267_v23, %v260_v6 }
 0x399   :  { %v269_v25 = vsub.f32 %v256_v5, %v268_v24 }
 0x39b   :  { %271 = vmax.xlane.f32.xlu0 %v269_v25  ;;  %270 = vst [vmem:[#allocation8] sm:$0xff] %v269_v25 }
 0x428   :  { %v272_v38 = vpop.xlane.xlu0 %271 }
 0x429   :  { %v289_v39 = vsub.f32 %v269_v25, %v272_v38 }
 0x42b   :  { %v290_v40 = vmul.f32 1.442695, %v289_v39 }
 0x42d   :  { %643 = vpow2.f32 %v290_v40 }
 0x437   :  { %v644_v41 = vpop.eup %643 }
 0x438   :  { %552 = vmatmul.mubr.f32.vlgmr.msra.gmra.mrb[2].mxu0 %v644_v41 }
 0x439   :  { %724 = shalt.err (!%p721_p0)
}
 0x43a   :  { %s725_s6 = scalar_lea.hbm %s901_s3, 128 }
 0x43b   :  { %p726_p1 = scmp.ne.s32.totalorder %s901_s3, %s725_s6  ;;  %p729_p2 = scmp.lt.u32.totalorder %s725_s6, %s901_s3 }
 0x43d   :  { %p731_p3 = pnand %p729_p2, %p726_p1 }
 0x43f   :  { %734 = shalt.err (!%p731_p3)
}
 0x440   :  { %375 = dma.vmem_to_hbm [thread:$0]  %s373_s28, 128, %s901_s3, [#allocation4]  }
 0x441   :  { %s777_s12 = smov [#allocation9]  }
 0x442   :  { %s382_s13 = sshll.u32 %s777_s12, 4  ;;  %s383_s13 = int_to_ptr.vmem [resolvable:$true] %s382_s13 }
 0x443   :  { %s735_s14 = scalar_lea.vmem %s383_s13, 128  ;;  %p740_p5 = scmp.lt.s32.totalorder %s383_s13, %s383_s13 }
 0x444   :  { %p736_p4 = scmp.ne.s32.totalorder %s383_s13, %s735_s14  ;;  %p741_p6 = scmp.lt.s32.totalorder %s735_s14, %s735_s14 }
 0x446   :  { %p742_p7 = por %p741_p6, %p740_p5 }
 0x448   :  { %p743_p8 = pnand %p742_p7, %p736_p4 }
 0x50b   :  { %v358_v0 = vpop.f32.mrb[2].mxu0 }
 0x50c   :  { %645 = vlog2.f32 %v358_v0  ;;  %v553_v42 = vpop.f32.mrb[3].mxu0 }
 0x516   :  { %v646_v43 = vpop.eup %645 }
 0x517   :  { %v363_v44 = vmul.f32 0.6931472, %v646_v43 }
 0x519   :  { %v364_v45 = vadd.f32 %v363_v44, %v272_v38 }
 0x51b   :  { %365 = vst [vmem:[#allocation9] sm:$0xff] %v364_v45 }
 0x51c   :  { %746 = shalt.err (!%p743_p8)
}
 0x51d   :  { %s747_s3 = scalar_lea.hbm %s902_s4, 128 }
 0x51e   :  { %p748_p9 = scmp.ne.s32.totalorder %s902_s4, %s747_s3  ;;  %p751_p10 = scmp.lt.u32.totalorder %s747_s3, %s902_s4 }
 0x520   :  { %p753_p11 = pnand %p751_p10, %p748_p9 }
 0x522   :  { %756 = shalt.err (!%p753_p11)
}
 0x523   :  { %385 = dma.vmem_to_hbm [thread:$0]  %s383_s13, 128, %s902_s4, [#allocation10]  }
 0x524   :  { %761 = dma.done.wait [#allocation4], 128  }
 0x525   :  { %762 = vsyncadd [#allocation4], 4294967168 }
 0x526   :  { %763 = dma.done.wait [#allocation10], 128  }
 0x527   :  { %764 = vsyncadd [#allocation10], 4294967168 }
 0x528   :  { %392 = vsyncpa [#allocation3], 1 }
 0x529   :  { %393 = vsyncpa [#allocation6], 1 }
 0x52a   :  { %394 = vsyncpa [#allocation4], 1 }
 0x52b   :  { %395 = vsyncpa [#allocation10], 1 }

</bundles_post_ra>
